<compile_context>
chip_gen: v6e
topology: v6e:2x2x1
jax: 0.10.0
libtpu: 0.0.40
codegen_flags: <defaults>
</compile_context>

<pallas_src>
import functools

import jax
import jax.numpy as jnp
from jax.experimental import pallas as pl
from jax.experimental.pallas import tpu as pltpu

N_PAD = 128  # lane-dense width of the in-VMEM compute slab (one lane tile)


def neuron_kernel(x_ref, w_ref, b_ref, o_ref):
    # x_ref: (TB, K)      VMEM input tile
    # w_ref: (K, N_PAD)   VMEM weight.T, zero-padded along lanes (resident)
    # b_ref: (1, N_PAD)   VMEM bias, zero-padded along lanes (resident)
    # o_ref: (TB, N)      VMEM output tile -- only the real target columns
    x = x_ref[...].astype(jnp.float32)
    w = w_ref[...].astype(jnp.float32)
    k_dim = x.shape[1]
    n_out = o_ref.shape[1]

    # Unrolled VPU contraction over the lane-dense compute slab:
    #   z = b + sum_k outer(x[:, k], w[k, :])
    # K (=5) is a small static constant, so the Python loop fully unrolls.
    # No MXU: a K=5, N=3 contraction is pure VPU territory.
    z = jnp.broadcast_to(b_ref[...].astype(jnp.float32), (x.shape[0], N_PAD))
    for k in range(k_dim):
        z = z + x[:, k:k + 1] * w[k:k + 1, :]

    # sigmoid(z) = 1 / (1 + exp(-z)); exp and approximate reciprocal both
    # issue on the EUP slot, keeping the f32 divide off the VALU slots.
    e = jnp.exp(-z)
    s = pl.reciprocal(1.0 + e, approx=True)

    # Store only the real target columns; rows past the batch end (partial
    # edge block) are masked out of the HBM writeback by Pallas.
    o_ref[...] = s[:, :n_out].astype(o_ref.dtype)


def _round_up(v, m):
    return ((v + m - 1) // m) * m


def prepare_neuron_params(weight, bias, dtype=jnp.float32):
    """One-time layout plumbing: transpose + zero-pad params to a lane-dense slab.

    weight: (n_targets, n_dims) as in torch.nn.Linear; bias: (n_targets,).
    """
    n_targets, n_dims = weight.shape
    w_pad = jnp.zeros((n_dims, N_PAD), dtype).at[:, :n_targets].set(
        weight.T.astype(dtype))
    b_pad = jnp.zeros((1, N_PAD), dtype).at[:, :n_targets].set(
        bias.astype(dtype)[None, :])
    return w_pad, b_pad, n_targets


def _choose_tile(batch, max_tile=2048):
    # f32 sublane minimum is 8 rows.  For large batches aim for >=4 grid steps
    # so a "parallel" batch axis shards across both v7x TensorCores; cap the
    # tile so the lane-padded, double-buffered VMEM footprint stays ~4 MiB.
    if batch <= 8:
        return 8
    if batch >= 256:
        tb = _round_up(pl.cdiv(batch, 4), 8)
    else:
        tb = _round_up(batch, 8)
    return min(tb, max_tile)


@functools.partial(jax.jit, static_argnames=("n_targets", "block_batch"))
def neuron_forward_pallas(x, w_pad, b_pad, *, n_targets, block_batch=2048):
    """sigmoid(x @ W.T + b) with pre-prepared (padded) parameters."""
    batch, n_dims = x.shape
    tb = _choose_tile(batch, block_batch)
    grid = (pl.cdiv(batch, tb),)  # partial edge block handled by Pallas

    cost = pl.CostEstimate(
        flops=2 * batch * n_dims * n_targets,
        transcendentals=batch * n_targets,
        bytes_accessed=4 * (batch * n_dims + n_dims * N_PAD + N_PAD
                            + batch * n_targets),
    )

    return pl.pallas_call(
        neuron_kernel,
        out_shape=jax.ShapeDtypeStruct((batch, n_targets), x.dtype),
        grid_spec=pltpu.PrefetchScalarGridSpec(
            num_scalar_prefetch=0,
            grid=grid,
            in_specs=[
                pl.BlockSpec((tb, n_dims), lambda i: (i, 0)),      # x tile
                pl.BlockSpec((n_dims, N_PAD), lambda i: (0, 0)),   # weight (resident)
                pl.BlockSpec((1, N_PAD), lambda i: (0, 0)),        # bias (resident)
            ],
            out_specs=pl.BlockSpec((tb, n_targets), lambda i: (i, 0)),
        ),
        compiler_params=pltpu.CompilerParams(
            dimension_semantics=("parallel",),
        ),
        cost_estimate=cost,
    )(x, w_pad, b_pad)


def neuron_forward(x, weight, bias, *, small_batch_fallback=0):
    """Convenience wrapper taking raw PyTorch-layout params.

    For tiny batches the fixed pallas_call overhead dwarfs the ~160 B of work,
    so an XLA fallback is available via small_batch_fallback > 0.
    """
    if small_batch_fallback and x.shape[0] < small_batch_fallback:
        return jax.nn.sigmoid(x @ weight.T.astype(x.dtype) + bias.astype(x.dtype))
    w_pad, b_pad, n_targets = prepare_neuron_params(weight, bias, x.dtype)
    return neuron_forward_pallas(x, w_pad, b_pad, n_targets=n_targets)


if __name__ == "__main__":
    n_dims, n_targets = 5, 3

    key = jax.random.PRNGKey(0)
    kx, kw, kb, kx2 = jax.random.split(key, 4)

    # Parameter init matching PyTorch Linear's default
    # (uniform in [-1/sqrt(fan_in), 1/sqrt(fan_in)]).
    bound = 1.0 / (n_dims ** 0.5)
    weight = jax.random.uniform(
        kw, (n_targets, n_dims), jnp.float32, minval=-bound, maxval=bound)
    bias = jax.random.uniform(
        kb, (n_targets,), jnp.float32, minval=-bound, maxval=bound)

    # One-time parameter layout prep (hoisted out of the forward path).
    w_pad, b_pad, nt = prepare_neuron_params(weight, bias)

    # Small batch (matches the example usage; single grid step).
    batch = 8
    x = jax.random.normal(kx, (batch, n_dims), jnp.float32)
    out = jax.block_until_ready(
        neuron_forward_pallas(x, w_pad, b_pad, n_targets=nt))
    ref = jax.nn.sigmoid(x @ weight.T + bias)
    assert out.shape == (batch, n_targets)
    # Tolerance covers the EUP approximate-reciprocal used for 1/(1+e^-z).
    assert jnp.allclose(out, ref, atol=2e-3, rtol=2e-3), float(
        jnp.max(jnp.abs(out - ref)))

    # Larger, non-multiple batch: exercises the cdiv grid / partial edge block.
    x2 = jax.random.normal(kx2, (1000, n_dims), jnp.float32)
    out2 = jax.block_until_ready(
        neuron_forward_pallas(x2, w_pad, b_pad, n_targets=nt))
    ref2 = jax.nn.sigmoid(x2 @ weight.T + bias)
    assert out2.shape == (1000, n_targets)
    assert jnp.allclose(out2, ref2, atol=2e-3, rtol=2e-3)

    # Convenience wrapper with the small-batch XLA fallback path.
    out3 = jax.block_until_ready(
        neuron_forward(x, weight, bias, small_batch_fallback=1024))
    assert jnp.allclose(out3, ref, atol=1e-5, rtol=1e-5)

    print("KERNEL_OK")
</pallas_src>

<mosaic_0001>
module attributes {stable_mosaic.version = 11 : i64} {
  func.func @neuron_kernel(%arg0: i32, %arg1: memref<8x5xf32, #tpu.memory_space<vmem>>, %arg2: memref<5x128xf32, #tpu.memory_space<vmem>>, %arg3: memref<1x128xf32, #tpu.memory_space<vmem>>, %arg4: memref<8x3xf32, #tpu.memory_space<vmem>>) attributes {dimension_semantics = [#tpu.dimension_semantics<parallel>], iteration_bounds = array<i64: 1>, scalar_prefetch = 0 : i64, scratch_operands = 0 : i64, tpu.core_type = #tpu.core_type<tc>, window_params = [{transform_indices = @transform_0, window_bounds = array<i64: 8, 5>}, {pipeline_mode = #tpu.pipeline_mode<synchronous>, transform_indices = @transform_1, window_bounds = array<i64: 5, 128>}, {pipeline_mode = #tpu.pipeline_mode<synchronous>, transform_indices = @transform_2, window_bounds = array<i64: 1, 128>}, {transform_indices = @transform_3, window_bounds = array<i64: 8, 3>}]} {
    %c0 = arith.constant 0 : index
    %c0_0 = arith.constant 0 : index
    %0 = vector.load %arg1[%c0, %c0_0] : memref<8x5xf32, #tpu.memory_space<vmem>>, vector<8x5xf32>
    %c0_1 = arith.constant 0 : index
    %c0_2 = arith.constant 0 : index
    %1 = vector.load %arg2[%c0_1, %c0_2] : memref<5x128xf32, #tpu.memory_space<vmem>>, vector<5x128xf32>
    %c0_3 = arith.constant 0 : index
    %c0_4 = arith.constant 0 : index
    %2 = vector.load %arg3[%c0_3, %c0_4] : memref<1x128xf32, #tpu.memory_space<vmem>>, vector<1x128xf32>
    %3 = vector.shape_cast %2 : vector<1x128xf32> to vector<1x128xf32>
    %4 = vector.broadcast %3 : vector<1x128xf32> to vector<8x128xf32>
    %5 = vector.extract_strided_slice %0 {offsets = [0, 0], sizes = [8, 1], strides = [1, 1]} : vector<8x5xf32> to vector<8x1xf32>
    %6 = vector.extract_strided_slice %1 {offsets = [0, 0], sizes = [1, 128], strides = [1, 1]} : vector<5x128xf32> to vector<1x128xf32>
    %7 = vector.broadcast %5 : vector<8x1xf32> to vector<8x128xf32>
    %8 = vector.broadcast %6 : vector<1x128xf32> to vector<8x128xf32>
    %9 = arith.mulf %7, %8 : vector<8x128xf32>
    %10 = arith.addf %4, %9 : vector<8x128xf32>
    %11 = vector.extract_strided_slice %0 {offsets = [0, 1], sizes = [8, 1], strides = [1, 1]} : vector<8x5xf32> to vector<8x1xf32>
    %12 = vector.extract_strided_slice %1 {offsets = [1, 0], sizes = [1, 128], strides = [1, 1]} : vector<5x128xf32> to vector<1x128xf32>
    %13 = vector.broadcast %11 : vector<8x1xf32> to vector<8x128xf32>
    %14 = vector.broadcast %12 : vector<1x128xf32> to vector<8x128xf32>
    %15 = arith.mulf %13, %14 : vector<8x128xf32>
    %16 = arith.addf %10, %15 : vector<8x128xf32>
    %17 = vector.extract_strided_slice %0 {offsets = [0, 2], sizes = [8, 1], strides = [1, 1]} : vector<8x5xf32> to vector<8x1xf32>
    %18 = vector.extract_strided_slice %1 {offsets = [2, 0], sizes = [1, 128], strides = [1, 1]} : vector<5x128xf32> to vector<1x128xf32>
    %19 = vector.broadcast %17 : vector<8x1xf32> to vector<8x128xf32>
    %20 = vector.broadcast %18 : vector<1x128xf32> to vector<8x128xf32>
    %21 = arith.mulf %19, %20 : vector<8x128xf32>
    %22 = arith.addf %16, %21 : vector<8x128xf32>
    %23 = vector.extract_strided_slice %0 {offsets = [0, 3], sizes = [8, 1], strides = [1, 1]} : vector<8x5xf32> to vector<8x1xf32>
    %24 = vector.extract_strided_slice %1 {offsets = [3, 0], sizes = [1, 128], strides = [1, 1]} : vector<5x128xf32> to vector<1x128xf32>
    %25 = vector.broadcast %23 : vector<8x1xf32> to vector<8x128xf32>
    %26 = vector.broadcast %24 : vector<1x128xf32> to vector<8x128xf32>
    %27 = arith.mulf %25, %26 : vector<8x128xf32>
    %28 = arith.addf %22, %27 : vector<8x128xf32>
    %29 = vector.extract_strided_slice %0 {offsets = [0, 4], sizes = [8, 1], strides = [1, 1]} : vector<8x5xf32> to vector<8x1xf32>
    %30 = vector.extract_strided_slice %1 {offsets = [4, 0], sizes = [1, 128], strides = [1, 1]} : vector<5x128xf32> to vector<1x128xf32>
    %31 = vector.broadcast %29 : vector<8x1xf32> to vector<8x128xf32>
    %32 = vector.broadcast %30 : vector<1x128xf32> to vector<8x128xf32>
    %33 = arith.mulf %31, %32 : vector<8x128xf32>
    %34 = arith.addf %28, %33 : vector<8x128xf32>
    %cst = arith.constant 0.000000e+00 : f32
    %35 = vector.broadcast %cst : f32 to vector<8x128xf32>
    %36 = arith.subf %35, %34 : vector<8x128xf32>
    %37 = math.exp %36 : vector<8x128xf32>
    %cst_5 = arith.constant 1.000000e+00 : f32
    %38 = vector.broadcast %cst_5 : f32 to vector<8x128xf32>
    %39 = arith.addf %38, %37 : vector<8x128xf32>
    %40 = tpu.reciprocal %39 {approx = true} : vector<8x128xf32> -> vector<8x128xf32>
    %41 = vector.extract_strided_slice %40 {offsets = [0, 0], sizes = [8, 3], strides = [1, 1]} : vector<8x128xf32> to vector<8x3xf32>
    %c0_6 = arith.constant 0 : index
    %c0_7 = arith.constant 0 : index
    %42 = vector.load %arg4[%c0_6, %c0_7] : memref<8x3xf32, #tpu.memory_space<vmem>>, vector<8x3xf32>
    tpu.vector_store %arg4[%c0_6, %c0_7], %41 {strides = array<i32>} : memref<8x3xf32, #tpu.memory_space<vmem>>, vector<8x3xf32>,
    return
  }
  func.func @transform_0(%arg0: i32) -> (i32, i32) {
    %c0_i32 = arith.constant 0 : i32
    %c0_i32_0 = arith.constant 0 : i32
    return %arg0, %c0_i32 : i32, i32
  }
  func.func @transform_1(%arg0: i32) -> (i32, i32) {
    %c0_i32 = arith.constant 0 : i32
    %c0_i32_0 = arith.constant 0 : i32
    %c0_i32_1 = arith.constant 0 : i32
    return %c0_i32, %c0_i32_0 : i32, i32
  }
  func.func @transform_2(%arg0: i32) -> (i32, i32) {
    %c0_i32 = arith.constant 0 : i32
    %c0_i32_0 = arith.constant 0 : i32
    %c0_i32_1 = arith.constant 0 : i32
    return %c0_i32, %c0_i32_0 : i32, i32
  }
  func.func @transform_3(%arg0: i32) -> (i32, i32) {
    %c0_i32 = arith.constant 0 : i32
    %c0_i32_0 = arith.constant 0 : i32
    return %arg0, %c0_i32 : i32, i32
  }
}

</mosaic_0001>

<bundles_post_ra>
// kernel: neuron_forward_pallas.1
= control target key start
LH: loop header
LB: loop body
LE: loop exit
PB: predicated region body
PF: predicated region fallthrough
CT: control target
= control target key end

     0   :  { %8 = vsyncpa [#allocation3], 0  ;;  %s212_s0 = inlined_call_operand.hbm [shape: f32[8,5], index: 0, kind: input, shape index: {}]   ;;  %s213_s1 = inlined_call_operand.hbm [shape: f32[5,128], index: 1, kind: input, shape index: {}]   ;;  %s214_s2 = inlined_call_operand.vmem [shape: f32[1,128], index: 2, kind: input, shape index: {}]   ;;  %s215_s3 = inlined_call_operand.vmem [shape: f32[8,3], index: 3, kind: output, shape index: {}]  }
   0x1   :  { %9 = vsyncpa [#allocation5], 0  ;;  %s173_s12 = smov [#allocation2]   ;;  %s174_s14 = smov [#allocation4]  }
   0x2   :  { %s16_s13 = sshll.u32 %s173_s12, 4  ;;  %s26_s15 = sshll.u32 %s174_s14, 4  ;;  %s17_s13 = int_to_ptr.vmem [resolvable:$true] %s16_s13  ;;  %s27_s15 = int_to_ptr.vmem [resolvable:$true] %s26_s15 }
   0x3   :  { %s137_s16 = scalar_lea.vmem %s17_s13, 128  ;;  %p142_p1 = scmp.lt.s32.totalorder %s17_s13, %s17_s13 }
   0x4   :  { %p138_p0 = scmp.ne.s32.totalorder %s17_s13, %s137_s16  ;;  %p143_p2 = scmp.lt.s32.totalorder %s137_s16, %s137_s16 }
   0x6   :  { %p144_p3 = por %p143_p2, %p142_p1 }
   0x8   :  { %p145_p4 = pnand %p144_p3, %p138_p0 }
   0xa   :  { %148 = shalt.err (!%p145_p4)
}
   0xb   :  { %19 = dma.hbm_to_vmem [thread:$0]  %s212_s0, 128, %s17_s13, [#allocation3]  }
   0xc   :  { %s157_s19 = scalar_lea.vmem %s27_s15, 128  ;;  %p162_p6 = scmp.lt.s32.totalorder %s27_s15, %s27_s15 }
   0xd   :  { %p158_p5 = scmp.ne.s32.totalorder %s27_s15, %s157_s19  ;;  %p163_p7 = scmp.lt.s32.totalorder %s157_s19, %s157_s19 }
   0xf   :  { %p164_p8 = por %p163_p7, %p162_p6 }
  0x11   :  { %p165_p9 = pnand %p164_p8, %p158_p5 }
  0x13   :  { %168 = shalt.err (!%p165_p9)
}
  0x14   :  { %29 = dma.hbm_to_vmem [thread:$0]  %s213_s1, 128, %s27_s15, [#allocation5]  }
  0x15   :  { %169 = dma.done.wait [#allocation3], 128  }
  0x16   :  { %170 = vsyncadd [#allocation3], 4294967168 }
  0x17   :  { %171 = dma.done.wait [#allocation5], 128  }
  0x18   :  { %172 = vsyncadd [#allocation5], 4294967168  ;;  %v175_v0 = vmov 0   ;;  %v176_v1 = vmov 2   ;;  %v38_v2 = vld [vmem:[#allocation2] sm:$0xff]  ;;  %v177_v3 = vmov 1   ;;  %v52_v6 = vlaneseq }
  0x19   :  { %119 = vset.pattern.permute.xlu0 %v175_v0  ;;  %121 = vset.pattern.permute.xlu1 %v176_v1  ;;  %v178_v4 = vmov 3   ;;  %v179_v5 = vmov 4   ;;  %v39_v9 = vld [vmem:[#allocation4] sm:$0x1f]  ;;  %v111_v18 = vld [vmem:[%s214_s2] ss:$0 sm:$0xff] }
  0x1a   :  { %49 = vperm.xlu0 %119, %v38_v2   ;;  %69 = vperm.xlu1 %121, %v38_v2   ;;  %v53_v7 = vshrl.u32 %v52_v6, 7  ;;  %vm103_vm0 = vcmask 23552  }
  0x1c   :  { %v54_v8 = vsub.s32 0, %v53_v7  ;;  %v64_v11 = vsub.s32 1, %v53_v7  ;;  %v74_v13 = vsub.s32 2, %v53_v7  ;;  %v84_v17 = vsub.s32 3, %v53_v7 }
  0x1d   :  { %v94_v19 = vsub.s32 4, %v53_v7 }
  0x1e   :  { %120 = vset.pattern.permute.xlu0 %v177_v3  ;;  %122 = vset.pattern.permute.xlu1 %v178_v4  ;;  %v55_v10 = vrot.slane %v39_v9, %v54_v8  ;;  %v65_v16 = vrot.slane %v39_v9, %v64_v11  ;;  %v75_v20 = vrot.slane %v39_v9, %v74_v13 }
  0x1f   :  { %59 = vperm.xlu0 %120, %v38_v2   ;;  %79 = vperm.xlu1 %122, %v38_v2   ;;  %v85_v25 = vrot.slane %v39_v9, %v84_v17  ;;  %v95_v26 = vrot.slane %v39_v9, %v94_v19 }
  0x23   :  { %123 = vset.pattern.permute.xlu1 %v179_v5  ;;  %124 = vset.pattern.permute.xlu0 %v179_v5 }
  0x24   :  { %89 = vperm.xlu1 %123, %v38_v2  }
  0x95   :  { %v50_v12 = vpop.permute.xlu0 %49  ;;  %v70_v14 = vpop.permute.xlu1 %69 }
  0x96   :  { %v56_v15 = vmul.f32 %v55_v10, %v50_v12  ;;  %v76_v27 = vmul.f32 %v75_v20, %v70_v14 }
  0x98   :  { %v57_v23 = vadd.f32 %v111_v18, %v56_v15 }
  0x9a   :  { %v60_v21 = vpop.permute.xlu0 %59  ;;  %v80_v22 = vpop.permute.xlu1 %79 }
  0x9b   :  { %v66_v24 = vmul.f32 %v65_v16, %v60_v21  ;;  %v86_v30 = vmul.f32 %v85_v25, %v80_v22 }
  0x9d   :  { %v67_v28 = vadd.f32 %v66_v24, %v57_v23 }
  0x9f   :  { %v77_v29 = vadd.f32 %v76_v27, %v67_v28  ;;  %v90_v31 = vpop.permute.xlu1 %89 }
  0xa0   :  { %v96_v32 = vmul.f32 %v95_v26, %v90_v31 }
  0xa1   :  { %v87_v33 = vadd.f32 %v86_v30, %v77_v29 }
  0xa3   :  { %v97_v34 = vadd.f32 %v96_v32, %v87_v33 }
  0xa5   :  { %v98_v35 = vsub.f32 0.0, %v97_v34 }
  0xa7   :  { %v99_v36 = vmul.f32 1.442695, %v98_v35 }
  0xa9   :  { %125 = vpow2.f32 %v99_v36 }
  0xb6   :  { %v126_v37 = vpop.eup %125 }
  0xb7   :  { %v101_v38 = vadd.f32 1.0, %v126_v37 }
  0xb9   :  { %127 = vrcp.f32 %v101_v38 }
  0xc6   :  { %v128_v39 = vpop.eup %127 }
  0xc7   :  { %104 = vst.msk [vmem:[%s215_s3] sm:$0xff] %vm103_vm0, %v128_v39 }
  0xc8   :  { %109 = vsyncpa [#allocation3], 1 }
  0xc9   :  { %110 = vsyncpa [#allocation5], 1 }

</bundles_post_ra>
